<compile_context>
chip_gen: v5e
topology: v5e:2x2
jax: 0.10.0
libtpu: 0.0.40
codegen_flags: <defaults>
</compile_context>

<pallas_src>
import functools

import numpy as np
import jax
import jax.numpy as jnp
from jax.experimental import pallas as pl
from jax.experimental.pallas import tpu as pltpu


def _round_up(x, m):
    return (x + m - 1) // m * m


# ----------------------------- Pallas kernel --------------------------------

def _cutout_kernel(x_ref, py_ref, pxt_ref, o_ref, tcat_ref, *, B, C, Hp, Sp):
    """One (batch-block, cutout) grid step.

    x_ref   : (B, C*Hp, W)       bf16  batch block of images, channels folded
    py_ref  : (1, Sp, Hp)        f32   vertical pooling matrix of this cutout
    pxt_ref : (1, W, Sp)         bf16  horizontal pooling matrix (transposed)
    o_ref   : (1, 1, Sp, B*C*Sp) f32   lane-dense output slab
    tcat_ref: (Hp, B*C*Sp)       f32   VMEM scratch for the rearranged pass-1
    """
    pxt = pxt_ref[0]                                            # (W, Sp)

    # Pass 1: per-(batch, channel) horizontal pooling on the MXU; each result
    # is stored directly into its 128-aligned lane slice of the scratch, so
    # there is no concat / relayout copy and the store of (b, c) hides under
    # the matmul of the next slab.
    for b in range(B):
        for c in range(C):
            t = jnp.dot(x_ref[b, c * Hp:(c + 1) * Hp, :], pxt,
                        preferred_element_type=jnp.float32)     # (Hp, Sp)
            j = (b * C + c) * Sp
            tcat_ref[:, j:j + Sp] = t

    # Pass 2: vertical pooling — one lane-dense matmul over all B*C slabs.
    # Kept in f32 (small matmul) to avoid re-quantizing the intermediate.
    o_ref[0, 0] = jnp.dot(py_ref[0], tcat_ref[...],
                          preferred_element_type=jnp.float32)


# ------------------------------ VMEM budgeting ------------------------------

def _vmem_bytes(B, C, Hp, W, Sp):
    return (2 * B * C * Hp * W * 2          # x        (bf16, double buffered)
            + 2 * Sp * Hp * 4               # py       (f32,  double buffered)
            + 2 * W * Sp * 2                # pxt      (bf16, double buffered)
            + 2 * Sp * B * C * Sp * 4       # out      (f32,  double buffered)
            + Hp * B * C * Sp * 4)          # tcat scratch (f32)


def _pick_bblk(N, C, Hp, W, Sp, cap_bytes=40 * 1024 * 1024):
    """Largest divisor of N (<= 8) whose per-step footprint fits the cap."""
    best = 1
    for d in range(1, min(N, 8) + 1):
        if N % d == 0 and _vmem_bytes(d, C, Hp, W, Sp) <= cap_bytes:
            best = d
    return best


# ------------------------------ Pallas wrapper -------------------------------

def make_cutouts_pallas(x, pys, pxts, cut_size):
    """x: (N, C, H, W) f32; pys: (cutn, Sp, Hp) f32; pxts: (cutn, W, Sp) f32.

    Returns (cutn*N, C, cut_size, cut_size) f32 in torch.cat order
    (cutout-major, batch-minor)."""
    N, C, H, W = x.shape
    cutn, Sp, Hp = pys.shape
    S = cut_size

    # Pad H to a sublane multiple and fold channels into matmul rows.  The
    # padded rows of x only ever meet zero columns of py, so this is exact.
    if Hp != H:
        x = jnp.pad(x, ((0, 0), (0, 0), (0, Hp - H), (0, 0)))
    x_r = x.reshape(N, C * Hp, W).astype(jnp.bfloat16)
    pxts_b = pxts.astype(jnp.bfloat16)     # big first matmul: bf16 operands
    pys_f = pys.astype(jnp.float32)        # small second matmul: stays f32

    Bblk = _pick_bblk(N, C, Hp, W, Sp)
    NB = N // Bblk

    kernel = functools.partial(_cutout_kernel, B=Bblk, C=C, Hp=Hp, Sp=Sp)

    flops = 2 * cutn * N * C * Hp * Sp * (W + Sp)
    bytes_accessed = (N * C * Hp * W * 2
                      + cutn * NB * (Sp * Hp * 4 + W * Sp * 2)
                      + cutn * NB * Sp * Bblk * C * Sp * 4)
    # Raise v5e's 16 MiB default scoped limit, stay under v7x's 64 MiB VMEM.
    vmem_limit = int(min(max(2 * _vmem_bytes(Bblk, C, Hp, W, Sp),
                             32 * 1024 * 1024),
                         56 * 1024 * 1024))

    out = pl.pallas_call(
        kernel,
        out_shape=jax.ShapeDtypeStruct((cutn, NB, Sp, Bblk * C * Sp),
                                       jnp.float32),
        grid_spec=pltpu.PrefetchScalarGridSpec(
            num_scalar_prefetch=0,
            # Cutout axis innermost: x's block index is invariant across it,
            # so each image block stays VMEM-resident for all cutn iterations.
            grid=(NB, cutn),
            in_specs=[
                pl.BlockSpec((Bblk, C * Hp, W), lambda bb, n: (bb, 0, 0)),
                pl.BlockSpec((1, Sp, Hp), lambda bb, n: (n, 0, 0)),
                pl.BlockSpec((1, W, Sp), lambda bb, n: (n, 0, 0)),
            ],
            out_specs=pl.BlockSpec((1, 1, Sp, Bblk * C * Sp),
                                   lambda bb, n: (n, bb, 0, 0)),
            scratch_shapes=[pltpu.VMEM((Hp, Bblk * C * Sp), jnp.float32)],
        ),
        compiler_params=pltpu.CompilerParams(
            # No cross-iteration carry -> both axes parallel, so the second
            # TensorCore on v7x gets work from cutn even when N is 1-2.
            dimension_semantics=("parallel", "parallel"),
            vmem_limit_bytes=vmem_limit),
        cost_estimate=pl.CostEstimate(flops=flops, transcendentals=0,
                                      bytes_accessed=bytes_accessed),
    )(x_r, pys_f, pxts_b)

    # (cutn, NB, Sp, Bblk*C*Sp) -> (cutn*N, C, S, S).  Slice the padding away
    # before the transpose so the relayout pass only touches valid data.
    # TODO(synk): consumers that accept the (cutn*N, S, C*S) slab directly
    # could skip this transpose entirely.
    out = out.reshape(cutn, NB, Sp, Bblk, C, Sp)[:, :, :S, :, :, :S]
    out = out.transpose(0, 1, 3, 4, 2, 5)
    return out.reshape(cutn * N, C, S, S)


# --------------------- on-device sampling / pooling matrices ----------------
# TODO(synk): the torch.rand/torch.randint stream cannot be replicated
# bit-exactly; sizes/offsets come from jax.random instead (drawn on device).

def _sample_cutout_params(key, cutn, cut_size, cut_pow, sideY, sideX):
    max_size = min(sideX, sideY)
    min_size = min(sideX, sideY, cut_size)
    ku, kx, ky = jax.random.split(key, 3)
    u = jax.random.uniform(ku, (cutn,), dtype=jnp.float32)
    sizes = (u ** cut_pow * (max_size - min_size) + min_size).astype(jnp.int32)
    offx = jax.random.randint(kx, (cutn,), 0, sideX - sizes + 1)
    offy = jax.random.randint(ky, (cutn,), 0, sideY - sizes + 1)
    return sizes, offy, offx


def _build_pool_matrices(sizes, offs, S, Sp, side):
    """(cutn, Sp, side) adaptive-avg-pool matrices; rows >= S are zero."""
    i = jnp.arange(Sp, dtype=jnp.int32)
    valid = i < S
    ic = jnp.minimum(i, S - 1)
    r0 = (ic[None, :] * sizes[:, None]) // S                    # (cutn, Sp)
    r1 = ((ic[None, :] + 1) * sizes[:, None] + (S - 1)) // S    # ceil
    w = jnp.where(valid[None, :], 1.0 / (r1 - r0).astype(jnp.float32), 0.0)
    pos = jnp.arange(side, dtype=jnp.int32)
    lo = (offs[:, None] + r0)[:, :, None]
    hi = (offs[:, None] + r1)[:, :, None]
    mask = (pos[None, None, :] >= lo) & (pos[None, None, :] < hi)
    return mask.astype(jnp.float32) * w[:, :, None]


def _make_cutouts_forward(x, key, *, cut_size, cutn, cut_pow):
    N, C, H, W = x.shape
    S = cut_size
    Sp = _round_up(S, 128)   # lane-dense output + aligned per-channel slabs
    Hp = _round_up(H, 8)     # sublane-aligned per-channel row slices
    sizes, offy, offx = _sample_cutout_params(key, cutn, S, cut_pow, H, W)
    pys = _build_pool_matrices(sizes, offy, S, Sp, Hp)          # (cutn, Sp, Hp)
    pxts = _build_pool_matrices(sizes, offx, S, Sp, W).transpose(0, 2, 1)
    out = make_cutouts_pallas(x, pys, pxts, S)
    return out, sizes, offy, offx


class MakeCutouts:
    """Pallas/TPU port of the PyTorch MakeCutouts module."""

    def __init__(self, cut_size, cutn, cut_pow=1.0):
        self.cut_size = cut_size
        self.cutn = cutn
        self.cut_pow = cut_pow
        self.last_params = None
        self._fwd = jax.jit(functools.partial(
            _make_cutouts_forward, cut_size=cut_size, cutn=cutn,
            cut_pow=cut_pow))

    def __call__(self, x, key):
        out, sizes, offy, offx = self._fwd(x, key)
        # Kept as device arrays; only the correctness test syncs them to host.
        self.last_params = (sizes, offy, offx)
        return out


# ------------------------------ reference -----------------------------------

def _adaptive_avg_pool2d_np(x, out_size):
    n, c, h, w = x.shape
    out = np.zeros((n, c, out_size, out_size), dtype=np.float32)
    for i in range(out_size):
        r0 = (i * h) // out_size
        r1 = ((i + 1) * h + out_size - 1) // out_size
        for j in range(out_size):
            c0 = (j * w) // out_size
            c1 = ((j + 1) * w + out_size - 1) // out_size
            out[:, :, i, j] = x[:, :, r0:r1, c0:c1].mean(axis=(2, 3))
    return out


def ref_make_cutouts(x_np, sizes, offy, offx, cut_size):
    outs = []
    for n in range(len(sizes)):
        size, oy, ox = int(sizes[n]), int(offy[n]), int(offx[n])
        cut = x_np[:, :, oy:oy + size, ox:ox + size]
        outs.append(_adaptive_avg_pool2d_np(cut, cut_size))
    return np.concatenate(outs, axis=0)


# -------------------------------- main ---------------------------------------

if __name__ == "__main__":
    key = jax.random.PRNGKey(0)
    k_x, k_cut = jax.random.split(key)

    N, C, H, W = 2, 4, 16, 16
    cut_size, cutn = 8, 4

    x = jax.random.normal(k_x, (N, C, H, W), dtype=jnp.float32)

    mc = MakeCutouts(cut_size, cutn, cut_pow=1.0)
    out = jax.block_until_ready(mc(x, k_cut))
    assert out.shape == (cutn * N, C, cut_size, cut_size), out.shape

    sizes, offy, offx = (np.asarray(a) for a in mc.last_params)
    ref = ref_make_cutouts(np.asarray(x), sizes, offy, offx, cut_size)
    # bf16 first-pass operands with f32 accumulation; second pass is f32.
    np.testing.assert_allclose(np.asarray(out), ref, rtol=2e-2, atol=2e-2)

    print("KERNEL_OK")
</pallas_src>

<mosaic_0001>
module attributes {stable_mosaic.version = 11 : i64} {
  func.func @_cutout_kernel(%arg0: i32, %arg1: i32, %arg2: memref<2x64x16xbf16, #tpu.memory_space<vmem>>, %arg3: memref<1x128x16xf32, #tpu.memory_space<vmem>>, %arg4: memref<1x16x128xbf16, #tpu.memory_space<vmem>>, %arg5: memref<1x1x128x1024xf32, #tpu.memory_space<vmem>>, %arg6: memref<16x1024xf32, #tpu.memory_space<vmem>>) attributes {dimension_semantics = [#tpu.dimension_semantics<parallel>, #tpu.dimension_semantics<parallel>], iteration_bounds = array<i64: 1, 4>, scalar_prefetch = 0 : i64, scratch_operands = 1 : i64, tpu.core_type = #tpu.core_type<tc>, window_params = [{transform_indices = @transform_0, window_bounds = array<i64: 2, 64, 16>}, {transform_indices = @transform_1, window_bounds = array<i64: 1, 128, 16>}, {transform_indices = @transform_2, window_bounds = array<i64: 1, 16, 128>}, {transform_indices = @transform_3, window_bounds = array<i64: 1, 1, 128, 1024>}]} {
    %c0 = arith.constant 0 : index
    %c0_0 = arith.constant 0 : index
    %c0_1 = arith.constant 0 : index
    %0 = vector.load %arg4[%c0, %c0_0, %c0_1] : memref<1x16x128xbf16, #tpu.memory_space<vmem>>, vector<1x16x128xbf16>
    %1 = vector.shape_cast %0 : vector<1x16x128xbf16> to vector<16x128xbf16>
    %c0_2 = arith.constant 0 : index
    %c0_3 = arith.constant 0 : index
    %c0_4 = arith.constant 0 : index
    %2 = vector.load %arg2[%c0_2, %c0_3, %c0_4] : memref<2x64x16xbf16, #tpu.memory_space<vmem>>, vector<1x16x16xbf16>
    %3 = vector.shape_cast %2 : vector<1x16x16xbf16> to vector<16x16xbf16>
    %cst = arith.constant dense<0.000000e+00> : vector<16x128xf32>
    %4 = tpu.matmul %3, %1, %cst {dimension_numbers = #tpu.dot_dimension_numbers<[1], [0], [0], [1], [0, 0, 1, 1], [], []>} : vector<16x16xbf16>, vector<16x128xbf16>, vector<16x128xf32> -> vector<16x128xf32>
    %c0_5 = arith.constant 0 : index
    %c0_6 = arith.constant 0 : index
    %5 = vector.load %arg6[%c0_5, %c0_6] : memref<16x1024xf32, #tpu.memory_space<vmem>>, vector<16x128xf32>
    tpu.vector_store %arg6[%c0_5, %c0_6], %4 {strides = array<i32>} : memref<16x1024xf32, #tpu.memory_space<vmem>>, vector<16x128xf32>,
    %c0_7 = arith.constant 0 : index
    %c16 = arith.constant 16 : index
    %c0_8 = arith.constant 0 : index
    %6 = vector.load %arg2[%c0_7, %c16, %c0_8] : memref<2x64x16xbf16, #tpu.memory_space<vmem>>, vector<1x16x16xbf16>
    %7 = vector.shape_cast %6 : vector<1x16x16xbf16> to vector<16x16xbf16>
    %cst_9 = arith.constant dense<0.000000e+00> : vector<16x128xf32>
    %8 = tpu.matmul %7, %1, %cst_9 {dimension_numbers = #tpu.dot_dimension_numbers<[1], [0], [0], [1], [0, 0, 1, 1], [], []>} : vector<16x16xbf16>, vector<16x128xbf16>, vector<16x128xf32> -> vector<16x128xf32>
    %c0_10 = arith.constant 0 : index
    %c128 = arith.constant 128 : index
    %9 = vector.load %arg6[%c0_10, %c128] : memref<16x1024xf32, #tpu.memory_space<vmem>>, vector<16x128xf32>
    tpu.vector_store %arg6[%c0_10, %c128], %8 {strides = array<i32>} : memref<16x1024xf32, #tpu.memory_space<vmem>>, vector<16x128xf32>,
    %c0_11 = arith.constant 0 : index
    %c32 = arith.constant 32 : index
    %c0_12 = arith.constant 0 : index
    %10 = vector.load %arg2[%c0_11, %c32, %c0_12] : memref<2x64x16xbf16, #tpu.memory_space<vmem>>, vector<1x16x16xbf16>
    %11 = vector.shape_cast %10 : vector<1x16x16xbf16> to vector<16x16xbf16>
    %cst_13 = arith.constant dense<0.000000e+00> : vector<16x128xf32>
    %12 = tpu.matmul %11, %1, %cst_13 {dimension_numbers = #tpu.dot_dimension_numbers<[1], [0], [0], [1], [0, 0, 1, 1], [], []>} : vector<16x16xbf16>, vector<16x128xbf16>, vector<16x128xf32> -> vector<16x128xf32>
    %c0_14 = arith.constant 0 : index
    %c256 = arith.constant 256 : index
    %13 = vector.load %arg6[%c0_14, %c256] : memref<16x1024xf32, #tpu.memory_space<vmem>>, vector<16x128xf32>
    tpu.vector_store %arg6[%c0_14, %c256], %12 {strides = array<i32>} : memref<16x1024xf32, #tpu.memory_space<vmem>>, vector<16x128xf32>,
    %c0_15 = arith.constant 0 : index
    %c48 = arith.constant 48 : index
    %c0_16 = arith.constant 0 : index
    %14 = vector.load %arg2[%c0_15, %c48, %c0_16] : memref<2x64x16xbf16, #tpu.memory_space<vmem>>, vector<1x16x16xbf16>
    %15 = vector.shape_cast %14 : vector<1x16x16xbf16> to vector<16x16xbf16>
    %cst_17 = arith.constant dense<0.000000e+00> : vector<16x128xf32>
    %16 = tpu.matmul %15, %1, %cst_17 {dimension_numbers = #tpu.dot_dimension_numbers<[1], [0], [0], [1], [0, 0, 1, 1], [], []>} : vector<16x16xbf16>, vector<16x128xbf16>, vector<16x128xf32> -> vector<16x128xf32>
    %c0_18 = arith.constant 0 : index
    %c384 = arith.constant 384 : index
    %17 = vector.load %arg6[%c0_18, %c384] : memref<16x1024xf32, #tpu.memory_space<vmem>>, vector<16x128xf32>
    tpu.vector_store %arg6[%c0_18, %c384], %16 {strides = array<i32>} : memref<16x1024xf32, #tpu.memory_space<vmem>>, vector<16x128xf32>,
    %c1 = arith.constant 1 : index
    %c0_19 = arith.constant 0 : index
    %c0_20 = arith.constant 0 : index
    %18 = vector.load %arg2[%c1, %c0_19, %c0_20] : memref<2x64x16xbf16, #tpu.memory_space<vmem>>, vector<1x16x16xbf16>
    %19 = vector.shape_cast %18 : vector<1x16x16xbf16> to vector<16x16xbf16>
    %cst_21 = arith.constant dense<0.000000e+00> : vector<16x128xf32>
    %20 = tpu.matmul %19, %1, %cst_21 {dimension_numbers = #tpu.dot_dimension_numbers<[1], [0], [0], [1], [0, 0, 1, 1], [], []>} : vector<16x16xbf16>, vector<16x128xbf16>, vector<16x128xf32> -> vector<16x128xf32>
    %c0_22 = arith.constant 0 : index
    %c512 = arith.constant 512 : index
    %21 = vector.load %arg6[%c0_22, %c512] : memref<16x1024xf32, #tpu.memory_space<vmem>>, vector<16x128xf32>
    tpu.vector_store %arg6[%c0_22, %c512], %20 {strides = array<i32>} : memref<16x1024xf32, #tpu.memory_space<vmem>>, vector<16x128xf32>,
    %c1_23 = arith.constant 1 : index
    %c16_24 = arith.constant 16 : index
    %c0_25 = arith.constant 0 : index
    %22 = vector.load %arg2[%c1_23, %c16_24, %c0_25] : memref<2x64x16xbf16, #tpu.memory_space<vmem>>, vector<1x16x16xbf16>
    %23 = vector.shape_cast %22 : vector<1x16x16xbf16> to vector<16x16xbf16>
    %cst_26 = arith.constant dense<0.000000e+00> : vector<16x128xf32>
    %24 = tpu.matmul %23, %1, %cst_26 {dimension_numbers = #tpu.dot_dimension_numbers<[1], [0], [0], [1], [0, 0, 1, 1], [], []>} : vector<16x16xbf16>, vector<16x128xbf16>, vector<16x128xf32> -> vector<16x128xf32>
    %c0_27 = arith.constant 0 : index
    %c640 = arith.constant 640 : index
    %25 = vector.load %arg6[%c0_27, %c640] : memref<16x1024xf32, #tpu.memory_space<vmem>>, vector<16x128xf32>
    tpu.vector_store %arg6[%c0_27, %c640], %24 {strides = array<i32>} : memref<16x1024xf32, #tpu.memory_space<vmem>>, vector<16x128xf32>,
    %c1_28 = arith.constant 1 : index
    %c32_29 = arith.constant 32 : index
    %c0_30 = arith.constant 0 : index
    %26 = vector.load %arg2[%c1_28, %c32_29, %c0_30] : memref<2x64x16xbf16, #tpu.memory_space<vmem>>, vector<1x16x16xbf16>
    %27 = vector.shape_cast %26 : vector<1x16x16xbf16> to vector<16x16xbf16>
    %cst_31 = arith.constant dense<0.000000e+00> : vector<16x128xf32>
    %28 = tpu.matmul %27, %1, %cst_31 {dimension_numbers = #tpu.dot_dimension_numbers<[1], [0], [0], [1], [0, 0, 1, 1], [], []>} : vector<16x16xbf16>, vector<16x128xbf16>, vector<16x128xf32> -> vector<16x128xf32>
    %c0_32 = arith.constant 0 : index
    %c768 = arith.constant 768 : index
    %29 = vector.load %arg6[%c0_32, %c768] : memref<16x1024xf32, #tpu.memory_space<vmem>>, vector<16x128xf32>
    tpu.vector_store %arg6[%c0_32, %c768], %28 {strides = array<i32>} : memref<16x1024xf32, #tpu.memory_space<vmem>>, vector<16x128xf32>,
    %c1_33 = arith.constant 1 : index
    %c48_34 = arith.constant 48 : index
    %c0_35 = arith.constant 0 : index
    %30 = vector.load %arg2[%c1_33, %c48_34, %c0_35] : memref<2x64x16xbf16, #tpu.memory_space<vmem>>, vector<1x16x16xbf16>
    %31 = vector.shape_cast %30 : vector<1x16x16xbf16> to vector<16x16xbf16>
    %cst_36 = arith.constant dense<0.000000e+00> : vector<16x128xf32>
    %32 = tpu.matmul %31, %1, %cst_36 {dimension_numbers = #tpu.dot_dimension_numbers<[1], [0], [0], [1], [0, 0, 1, 1], [], []>} : vector<16x16xbf16>, vector<16x128xbf16>, vector<16x128xf32> -> vector<16x128xf32>
    %c0_37 = arith.constant 0 : index
    %c896 = arith.constant 896 : index
    %33 = vector.load %arg6[%c0_37, %c896] : memref<16x1024xf32, #tpu.memory_space<vmem>>, vector<16x128xf32>
    tpu.vector_store %arg6[%c0_37, %c896], %32 {strides = array<i32>} : memref<16x1024xf32, #tpu.memory_space<vmem>>, vector<16x128xf32>,
    %c0_38 = arith.constant 0 : index
    %c0_39 = arith.constant 0 : index
    %c0_40 = arith.constant 0 : index
    %34 = vector.load %arg3[%c0_38, %c0_39, %c0_40] : memref<1x128x16xf32, #tpu.memory_space<vmem>>, vector<1x128x16xf32>
    %35 = vector.shape_cast %34 : vector<1x128x16xf32> to vector<128x16xf32>
    %c0_41 = arith.constant 0 : index
    %c0_42 = arith.constant 0 : index
    %36 = vector.load %arg6[%c0_41, %c0_42] : memref<16x1024xf32, #tpu.memory_space<vmem>>, vector<16x1024xf32>
    %cst_43 = arith.constant dense<0.000000e+00> : vector<128x1024xf32>
    %37 = tpu.matmul %35, %36, %cst_43 {dimension_numbers = #tpu.dot_dimension_numbers<[1], [0], [0], [1], [0, 0, 1, 1], [], []>} : vector<128x16xf32>, vector<16x1024xf32>, vector<128x1024xf32> -> vector<128x1024xf32>
    %c0_44 = arith.constant 0 : index
    %c0_45 = arith.constant 0 : index
    %c0_46 = arith.constant 0 : index
    %c0_47 = arith.constant 0 : index
    %38 = vector.load %arg5[%c0_44, %c0_45, %c0_46, %c0_47] : memref<1x1x128x1024xf32, #tpu.memory_space<vmem>>, vector<1x1x128x1024xf32>
    %39 = vector.shape_cast %38 : vector<1x1x128x1024xf32> to vector<128x1024xf32>
    %40 = vector.shape_cast %37 : vector<128x1024xf32> to vector<1x1x128x1024xf32>
    tpu.vector_store %arg5[%c0_44, %c0_45, %c0_46, %c0_47], %40 {strides = array<i32>} : memref<1x1x128x1024xf32, #tpu.memory_space<vmem>>, vector<1x1x128x1024xf32>,
    return
  }
  func.func @transform_0(%arg0: i32, %arg1: i32) -> (i32, i32, i32) {
    %c0_i32 = arith.constant 0 : i32
    %c0_i32_0 = arith.constant 0 : i32
    %c0_i32_1 = arith.constant 0 : i32
    return %arg0, %c0_i32, %c0_i32_0 : i32, i32, i32
  }
  func.func @transform_1(%arg0: i32, %arg1: i32) -> (i32, i32, i32) {
    %c0_i32 = arith.constant 0 : i32
    %c0_i32_0 = arith.constant 0 : i32
    %c0_i32_1 = arith.constant 0 : i32
    return %arg1, %c0_i32, %c0_i32_0 : i32, i32, i32
  }
  func.func @transform_2(%arg0: i32, %arg1: i32) -> (i32, i32, i32) {
    %c0_i32 = arith.constant 0 : i32
    %c0_i32_0 = arith.constant 0 : i32
    %c0_i32_1 = arith.constant 0 : i32
    return %arg1, %c0_i32, %c0_i32_0 : i32, i32, i32
  }
  func.func @transform_3(%arg0: i32, %arg1: i32) -> (i32, i32, i32, i32) {
    %c0_i32 = arith.constant 0 : i32
    %c0_i32_0 = arith.constant 0 : i32
    %c0_i32_1 = arith.constant 0 : i32
    return %arg1, %arg0, %c0_i32, %c0_i32_0 : i32, i32, i32, i32
  }
}

</mosaic_0001>

<bundles_post_ra>
// kernel: _make_cutouts_forward.1
= control target key start
LH: loop header
LB: loop body
LE: loop exit
PB: predicated region body
PF: predicated region fallthrough
CT: control target
= control target key end

     0   :  { %s1570_s12 = smov 0   ;;  %s1572_s13 = smov 0   ;;  %s2079_s0 = inlined_call_operand.vmem [shape: bf16[2,64,16], index: 0, kind: input, shape index: {}]   ;;  %s2080_s1 = inlined_call_operand.vmem [shape: f32[4,128,16], index: 1, kind: input, shape index: {}]   ;;  %s2081_s2 = inlined_call_operand.vmem [shape: bf16[4,16,128], index: 2, kind: input, shape index: {}]   ;;  %s2082_s3 = inlined_call_operand.vmem [shape: f32[4,1,128,1024], index: 3, kind: output, shape index: {}]  }
   0x1   :  { %s1574_s14 = smov 0  }
   0x2 LB: > { %s22_s15 = sadd.s32 1, %s1544_s13  ;;  %p1301_p0 = scmp.ge.s32.totalorder %s1548_s14, 1  ;;  %s1548_s14 = sphi %s1574_s14, %s13_s14   ;;  %s1544_s13 = sphi %s1572_s13, %s2084_s13   ;;  %s1540_s12 = sphi %s1570_s12, %s2083_s12  }
   0x3   : > { %p23_p1 = scmp.ge.s32.totalorder %s22_s15, 4  ;;  %p173_p2 = scmp.lt.s32.totalorder %s1548_s14, 5 }
   0x5   : > { %s2086_s15 = smov (%p23_p1, %s22_s15), 0  ;;  %p174_p3 = pnand %p1301_p0, %p173_p2 }
   0x6   : > { %p219_p4 = scmp.lt.s32.totalorder (!%p174_p3), %s1540_s12, 3 }
   0x7   : > { %177 = sbr.rel (%p174_p3) target bundleno = 544 (0x220), region = 32 }
   0xc   : > { %s2088_s12 = smov (!%p219_p4, %s1540_s12), 3  ;;  %v1496_v1 = vld [vmem:[%s2079_s0 + $0x10] sm:$0xff]  ;;  %v1497_v2 = vld [vmem:[%s2079_s0 + $0x18] sm:$0xff]  ;;  %vm254_vm0 = vcmask 130048   ;;  %v1494_v3 = vld [vmem:[%s2079_s0] sm:$0xff] }
   0xd   : > { %s1491_s16 = sshll.u32 %s2088_s12, 3  ;;  %v1495_v4 = vld [vmem:[%s2079_s0 + $0x8] sm:$0xff]  ;;  %v1500_v5 = vld [vmem:[%s2079_s0 + $0x30] sm:$0xff]  ;;  %v1501_v6 = vld [vmem:[%s2079_s0 + $0x38] sm:$0xff]  ;;  %s1490_s9 = sshll.u32 %s2088_s12, 7 }
   0xe   : > { %s228_s19 = scalar_lea.vmem %s2081_s2, %s1491_s16  ;;  %v1498_v7 = vld [vmem:[%s2079_s0 + $0x20] sm:$0xff]  ;;  %v1499_v8 = vld [vmem:[%s2079_s0 + $0x28] sm:$0xff]  ;;  %s1630_s16 = scalar_lea.vmem %s2080_s1, %s1490_s9 }
   0xf   : > { %v1493_v0 = vld [vmem:[%s228_s19] sm:$0xff]  ;;  %v1644_v20 = vld [vmem:[%s1630_s16 + $0x8] sm:$0xff]  ;;  %v1655_v25 = vld [vmem:[%s1630_s16 + $0x10] sm:$0xff]  ;;  %s1492_s17 = sshll.u32 %s2088_s12, 10 }
  0x10   : > { %317 = vmatpush.bf16.msra.mxu2 %v1493_v0  ;;  %343 = vmatpush.bf16.msra.mxu3 %v1493_v0  ;;  %v1633_v15 = vld [vmem:[%s1630_s16] sm:$0xff]  ;;  %v1666_v28 = vld [vmem:[%s1630_s16 + $0x18] sm:$0xff]  ;;  %v1688_v30 = vld [vmem:[%s1630_s16 + $0x28] sm:$0xff]  ;;  %s1808_s20 = scalar_lea.vmem %s2082_s3, %s1492_s17 }
  0x11   : > { %265 = vmatpush.bf16.msra.mxu0 %v1493_v0  ;;  %291 = vmatpush.bf16.msra.mxu1 %v1493_v0  ;;  %v1677_v29 = vld [vmem:[%s1630_s16 + $0x20] sm:$0xff]  ;;  %v1699_v31 = vld [vmem:[%s1630_s16 + $0x30] sm:$0xff]  ;;  %v1710_v32 = vld [vmem:[%s1630_s16 + $0x38] sm:$0xff] }
  0x12   : > { %v1721_v33 = vld [vmem:[%s1630_s16 + $0x40] sm:$0xff]  ;;  %v1732_v34 = vld [vmem:[%s1630_s16 + $0x48] sm:$0xff]  ;;  %v1743_v35 = vld [vmem:[%s1630_s16 + $0x50] sm:$0xff] }
  0x13   : > { %1326 = vmatmul.msk.bf16.vlgmr.msra.gmra.mxu2 %vm254_vm0, %v1496_v1  ;;  %1331 = vmatmul.msk.bf16.vlgmr.msra.gmra.mxu3 %vm254_vm0, %v1497_v2  ;;  %v1754_v36 = vld [vmem:[%s1630_s16 + $0x58] sm:$0xff]  ;;  %v1765_v37 = vld [vmem:[%s1630_s16 + $0x60] sm:$0xff]  ;;  %v1776_v38 = vld [vmem:[%s1630_s16 + $0x68] sm:$0xff] }
  0x14   : > { %422 = vmatpush.bf16.msrb.mxu2 %v1493_v0  ;;  %448 = vmatpush.bf16.msrb.mxu3 %v1493_v0  ;;  %v1787_v39 = vld [vmem:[%s1630_s16 + $0x70] sm:$0xff]  ;;  %v1798_v40 = vld [vmem:[%s1630_s16 + $0x78] sm:$0xff] }
  0x15   : > { %1316 = vmatmul.msk.bf16.vlgmr.msra.gmra.mxu0 %vm254_vm0, %v1494_v3  ;;  %1321 = vmatmul.msk.bf16.vlgmr.msra.gmra.mxu1 %vm254_vm0, %v1495_v4 }
  0x16   : > { %370 = vmatpush.bf16.msrb.mxu0 %v1493_v0  ;;  %396 = vmatpush.bf16.msrb.mxu1 %v1493_v0 }
  0x23   : > { %1352 = vmatmul.msk.bf16.vlgmr.msrb.gmra.mxu2 %vm254_vm0, %v1500_v5  ;;  %1359 = vmatmul.msk.bf16.vlgmr.msrb.gmra.mxu3 %vm254_vm0, %v1501_v6 }
  0x25   : > { %1338 = vmatmul.msk.bf16.vlgmr.msrb.gmra.mxu0 %vm254_vm0, %v1498_v7  ;;  %1345 = vmatmul.msk.bf16.vlgmr.msrb.gmra.mxu1 %vm254_vm0, %v1499_v8 }
  0x92   : > { %v267_v9 = vpop.f32.mrf.mxu0  ;;  %v293_v10 = vpop.f32.mrf.mxu1 }
  0x96   : > { %v319_v11 = vpop.f32.mrf.mxu2  ;;  %v345_v12 = vpop.f32.mrf.mxu3 }
  0x9a   : > { %v269_v13 = vpop.f32.mrf.mxu0  ;;  %v295_v14 = vpop.f32.mrf.mxu1 }
  0x9b   : > { %551 = vmatpush.msra.mxu0 %v269_v13  ;;  %616 = vmatpush.msra.mxu1 %v295_v14 }
  0x9d   : > { %552 = vmatpush.msra.mxu0 %v267_v9  ;;  %617 = vmatpush.msra.mxu1 %v293_v10 }
  0x9e   : > { %1360 = vmatmul.msk.f32.vlgmr.msra.gmra.mxu0 %vm254_vm0, %v1633_v15  ;;  %1376 = vmatmul.msk.f32.vlgmr.msra.gmra.mxu1 %vm254_vm0, %v1633_v15  ;;  %v321_v16 = vpop.f32.mrf.mxu2  ;;  %v347_v17 = vpop.f32.mrf.mxu3 }
  0x9f   : > { %681 = vmatpush.msra.mxu2 %v321_v16  ;;  %746 = vmatpush.msra.mxu3 %v347_v17 }
  0xa1   : > { %682 = vmatpush.msra.mxu2 %v319_v11  ;;  %747 = vmatpush.msra.mxu3 %v345_v12 }
  0xa2   : > { %v372_v18 = vpop.f32.mrf.mxu0  ;;  %v398_v19 = vpop.f32.mrf.mxu1  ;;  %1392 = vmatmul.msk.f32.vlgmr.msra.gmra.mxu2 %vm254_vm0, %v1633_v15  ;;  %1408 = vmatmul.msk.f32.vlgmr.msra.gmra.mxu3 %vm254_vm0, %v1633_v15 }
  0xa6   : > { %1361 = vmatmul.msk.f32.gmra.mxu0 %vm254_vm0, %v1644_v20  ;;  %1377 = vmatmul.msk.f32.gmra.mxu1 %vm254_vm0, %v1644_v20  ;;  %v424_v21 = vpop.f32.mrf.mxu2  ;;  %v450_v22 = vpop.f32.mrf.mxu3 }
  0xaa   : > { %v374_v23 = vpop.f32.mrf.mxu0  ;;  %v400_v24 = vpop.f32.mrf.mxu1  ;;  %1393 = vmatmul.msk.f32.gmra.mxu2 %vm254_vm0, %v1644_v20  ;;  %1409 = vmatmul.msk.f32.gmra.mxu3 %vm254_vm0, %v1644_v20 }
  0xab   : > { %811 = vmatpush.msrb.mxu0 %v374_v23  ;;  %876 = vmatpush.msrb.mxu1 %v400_v24 }
  0xad   : > { %812 = vmatpush.msrb.mxu0 %v372_v18  ;;  %877 = vmatpush.msrb.mxu1 %v398_v19 }
  0xae   : > { %1362 = vmatmul.msk.f32.gmra.mxu0 %vm254_vm0, %v1655_v25  ;;  %1378 = vmatmul.msk.f32.gmra.mxu1 %vm254_vm0, %v1655_v25  ;;  %v426_v26 = vpop.f32.mrf.mxu2  ;;  %v452_v27 = vpop.f32.mrf.mxu3 }
  0xaf   : > { %941 = vmatpush.msrb.mxu2 %v426_v26  ;;  %1006 = vmatpush.msrb.mxu3 %v452_v27 }
  0xb1   : > { %942 = vmatpush.msrb.mxu2 %v424_v21  ;;  %1007 = vmatpush.msrb.mxu3 %v450_v22 }
  0xb2   : > { %1394 = vmatmul.msk.f32.gmra.mxu2 %vm254_vm0, %v1655_v25  ;;  %1410 = vmatmul.msk.f32.gmra.mxu3 %vm254_vm0, %v1655_v25 }
  0xb6   : > { %1363 = vmatmul.msk.f32.gmra.mxu0 %vm254_vm0, %v1666_v28  ;;  %1379 = vmatmul.msk.f32.gmra.mxu1 %vm254_vm0, %v1666_v28 }
  0xba   : > { %1395 = vmatmul.msk.f32.gmra.mxu2 %vm254_vm0, %v1666_v28  ;;  %1411 = vmatmul.msk.f32.gmra.mxu3 %vm254_vm0, %v1666_v28 }
  0xbe   : > { %1364 = vmatmul.msk.f32.gmra.mxu0 %vm254_vm0, %v1677_v29  ;;  %1380 = vmatmul.msk.f32.gmra.mxu1 %vm254_vm0, %v1677_v29 }
  0xc2   : > { %1396 = vmatmul.msk.f32.gmra.mxu2 %vm254_vm0, %v1677_v29  ;;  %1412 = vmatmul.msk.f32.gmra.mxu3 %vm254_vm0, %v1677_v29 }
  0xc6   : > { %1365 = vmatmul.msk.f32.gmra.mxu0 %vm254_vm0, %v1688_v30  ;;  %1381 = vmatmul.msk.f32.gmra.mxu1 %vm254_vm0, %v1688_v30 }
  0xca   : > { %1397 = vmatmul.msk.f32.gmra.mxu2 %vm254_vm0, %v1688_v30  ;;  %1413 = vmatmul.msk.f32.gmra.mxu3 %vm254_vm0, %v1688_v30 }
  0xce   : > { %1366 = vmatmul.msk.f32.gmra.mxu0 %vm254_vm0, %v1699_v31  ;;  %1382 = vmatmul.msk.f32.gmra.mxu1 %vm254_vm0, %v1699_v31 }
  0xd2   : > { %1398 = vmatmul.msk.f32.gmra.mxu2 %vm254_vm0, %v1699_v31  ;;  %1414 = vmatmul.msk.f32.gmra.mxu3 %vm254_vm0, %v1699_v31 }
  0xd6   : > { %1367 = vmatmul.msk.f32.gmra.mxu0 %vm254_vm0, %v1710_v32  ;;  %1383 = vmatmul.msk.f32.gmra.mxu1 %vm254_vm0, %v1710_v32 }
  0xda   : > { %1399 = vmatmul.msk.f32.gmra.mxu2 %vm254_vm0, %v1710_v32  ;;  %1415 = vmatmul.msk.f32.gmra.mxu3 %vm254_vm0, %v1710_v32 }
  0xde   : > { %1368 = vmatmul.msk.f32.gmra.mxu0 %vm254_vm0, %v1721_v33  ;;  %1384 = vmatmul.msk.f32.gmra.mxu1 %vm254_vm0, %v1721_v33 }
  0xe2   : > { %1400 = vmatmul.msk.f32.gmra.mxu2 %vm254_vm0, %v1721_v33  ;;  %1416 = vmatmul.msk.f32.gmra.mxu3 %vm254_vm0, %v1721_v33 }
  0xe6   : > { %1369 = vmatmul.msk.f32.gmra.mxu0 %vm254_vm0, %v1732_v34  ;;  %1385 = vmatmul.msk.f32.gmra.mxu1 %vm254_vm0, %v1732_v34 }
  0xea   : > { %1401 = vmatmul.msk.f32.gmra.mxu2 %vm254_vm0, %v1732_v34  ;;  %1417 = vmatmul.msk.f32.gmra.mxu3 %vm254_vm0, %v1732_v34 }
  0xee   : > { %1370 = vmatmul.msk.f32.gmra.mxu0 %vm254_vm0, %v1743_v35  ;;  %1386 = vmatmul.msk.f32.gmra.mxu1 %vm254_vm0, %v1743_v35 }
  0xf2   : > { %1402 = vmatmul.msk.f32.gmra.mxu2 %vm254_vm0, %v1743_v35  ;;  %1418 = vmatmul.msk.f32.gmra.mxu3 %vm254_vm0, %v1743_v35 }
  0xf6   : > { %1371 = vmatmul.msk.f32.gmra.mxu0 %vm254_vm0, %v1754_v36  ;;  %1387 = vmatmul.msk.f32.gmra.mxu1 %vm254_vm0, %v1754_v36 }
  0xfa   : > { %1403 = vmatmul.msk.f32.gmra.mxu2 %vm254_vm0, %v1754_v36  ;;  %1419 = vmatmul.msk.f32.gmra.mxu3 %vm254_vm0, %v1754_v36 }
  0xfe   : > { %1372 = vmatmul.msk.f32.gmra.mxu0 %vm254_vm0, %v1765_v37  ;;  %1388 = vmatmul.msk.f32.gmra.mxu1 %vm254_vm0, %v1765_v37 }
 0x102   : > { %1404 = vmatmul.msk.f32.gmra.mxu2 %vm254_vm0, %v1765_v37  ;;  %1420 = vmatmul.msk.f32.gmra.mxu3 %vm254_vm0, %v1765_v37 }
 0x106   : > { %1373 = vmatmul.msk.f32.gmra.mxu0 %vm254_vm0, %v1776_v38  ;;  %1389 = vmatmul.msk.f32.gmra.mxu1 %vm254_vm0, %v1776_v38 }
 0x10a   : > { %1405 = vmatmul.msk.f32.gmra.mxu2 %vm254_vm0, %v1776_v38  ;;  %1421 = vmatmul.msk.f32.gmra.mxu3 %vm254_vm0, %v1776_v38 }
 0x10e   : > { %1374 = vmatmul.msk.f32.gmra.mxu0 %vm254_vm0, %v1787_v39  ;;  %1390 = vmatmul.msk.f32.gmra.mxu1 %vm254_vm0, %v1787_v39 }
 0x112   : > { %1406 = vmatmul.msk.f32.gmra.mxu2 %vm254_vm0, %v1787_v39  ;;  %1422 = vmatmul.msk.f32.gmra.mxu3 %vm254_vm0, %v1787_v39 }
 0x116   : > { %1375 = vmatmul.msk.f32.gmra.mxu0 %vm254_vm0, %v1798_v40  ;;  %1391 = vmatmul.msk.f32.gmra.mxu1 %vm254_vm0, %v1798_v40 }
 0x11a   : > { %1407 = vmatmul.msk.f32.gmra.mxu2 %vm254_vm0, %v1798_v40  ;;  %1423 = vmatmul.msk.f32.gmra.mxu3 %vm254_vm0, %v1798_v40 }
 0x11b   : > { %v554_v41 = vpop.f32.mrf.mxu0  ;;  %v619_v42 = vpop.f32.mrf.mxu1 }
 0x11c   : > { %1057 = vst [vmem:[%s1808_s20] sm:$0xff] %v554_v41 }
 0x11d   : > { %1058 = vst [vmem:[%s1808_s20 + $0x8] sm:$0xff] %v619_v42 }
 0x11e   : > { %1424 = vmatmul.msk.f32.vlgmr.msrb.gmra.mxu0 %vm254_vm0, %v1633_v15  ;;  %1440 = vmatmul.msk.f32.vlgmr.msrb.gmra.mxu1 %vm254_vm0, %v1633_v15 }
 0x122   : > { %1456 = vmatmul.msk.f32.vlgmr.msrb.gmra.mxu2 %vm254_vm0, %v1633_v15  ;;  %1472 = vmatmul.msk.f32.vlgmr.msrb.gmra.mxu3 %vm254_vm0, %v1633_v15 }
 0x123   : > { %v557_v43 = vpop.f32.mrf.mxu0  ;;  %v622_v44 = vpop.f32.mrf.mxu1 }
 0x124   : > { %1065 = vst [vmem:[%s1808_s20 + $0x40] sm:$0xff] %v557_v43 }
 0x125   : > { %1066 = vst [vmem:[%s1808_s20 + $0x48] sm:$0xff] %v622_v44  ;;  %v684_v45 = vpop.f32.mrf.mxu2  ;;  %v749_v46 = vpop.f32.mrf.mxu3 }
 0x126   : > { %1425 = vmatmul.msk.f32.gmra.mxu0 %vm254_vm0, %v1644_v20  ;;  %1441 = vmatmul.msk.f32.gmra.mxu1 %vm254_vm0, %v1644_v20  ;;  %1059 = vst [vmem:[%s1808_s20 + $0x10] sm:$0xff] %v684_v45 }
 0x127   : > { %1060 = vst [vmem:[%s1808_s20 + $0x18] sm:$0xff] %v749_v46 }
 0x12a   : > { %1457 = vmatmul.msk.f32.gmra.mxu2 %vm254_vm0, %v1644_v20  ;;  %1473 = vmatmul.msk.f32.gmra.mxu3 %vm254_vm0, %v1644_v20 }
 0x12b   : > { %v560_v47 = vpop.f32.mrf.mxu0  ;;  %v625_v48 = vpop.f32.mrf.mxu1 }
 0x12c   : > { %1073 = vst [vmem:[%s1808_s20 + $0x80] sm:$0xff] %v560_v47 }
 0x12d   : > { %1074 = vst [vmem:[%s1808_s20 + $0x88] sm:$0xff] %v625_v48  ;;  %v687_v49 = vpop.f32.mrf.mxu2  ;;  %v752_v50 = vpop.f32.mrf.mxu3 }
 0x12e   : > { %1426 = vmatmul.msk.f32.gmra.mxu0 %vm254_vm0, %v1655_v25  ;;  %1442 = vmatmul.msk.f32.gmra.mxu1 %vm254_vm0, %v1655_v25  ;;  %1067 = vst [vmem:[%s1808_s20 + $0x50] sm:$0xff] %v687_v49 }
 0x12f   : > { %1068 = vst [vmem:[%s1808_s20 + $0x58] sm:$0xff] %v752_v50 }
 0x132   : > { %1458 = vmatmul.msk.f32.gmra.mxu2 %vm254_vm0, %v1655_v25  ;;  %1474 = vmatmul.msk.f32.gmra.mxu3 %vm254_vm0, %v1655_v25 }
 0x133   : > { %v563_v51 = vpop.f32.mrf.mxu0  ;;  %v628_v52 = vpop.f32.mrf.mxu1 }
 0x134   : > { %1081 = vst [vmem:[%s1808_s20 + $0xc0] sm:$0xff] %v563_v51 }
 0x135   : > { %1082 = vst [vmem:[%s1808_s20 + $0xc8] sm:$0xff] %v628_v52  ;;  %v690_v53 = vpop.f32.mrf.mxu2  ;;  %v755_v54 = vpop.f32.mrf.mxu3 }
 0x136   : > { %1427 = vmatmul.msk.f32.gmra.mxu0 %vm254_vm0, %v1666_v28  ;;  %1443 = vmatmul.msk.f32.gmra.mxu1 %vm254_vm0, %v1666_v28  ;;  %1075 = vst [vmem:[%s1808_s20 + $0x90] sm:$0xff] %v690_v53 }
 0x137   : > { %1076 = vst [vmem:[%s1808_s20 + $0x98] sm:$0xff] %v755_v54 }
 0x13a   : > { %1459 = vmatmul.msk.f32.gmra.mxu2 %vm254_vm0, %v1666_v28  ;;  %1475 = vmatmul.msk.f32.gmra.mxu3 %vm254_vm0, %v1666_v28 }
 0x13b   : > { %v566_v55 = vpop.f32.mrf.mxu0  ;;  %v631_v56 = vpop.f32.mrf.mxu1 }
 0x13c   : > { %1089 = vst [vmem:[%s1808_s20 + $0x100] sm:$0xff] %v566_v55 }
 0x13d   : > { %1090 = vst [vmem:[%s1808_s20 + $0x108] sm:$0xff] %v631_v56  ;;  %v693_v57 = vpop.f32.mrf.mxu2  ;;  %v758_v58 = vpop.f32.mrf.mxu3 }
 0x13e   : > { %1428 = vmatmul.msk.f32.gmra.mxu0 %vm254_vm0, %v1677_v29  ;;  %1444 = vmatmul.msk.f32.gmra.mxu1 %vm254_vm0, %v1677_v29  ;;  %1083 = vst [vmem:[%s1808_s20 + $0xd0] sm:$0xff] %v693_v57 }
 0x13f   : > { %1084 = vst [vmem:[%s1808_s20 + $0xd8] sm:$0xff] %v758_v58 }
 0x142   : > { %1460 = vmatmul.msk.f32.gmra.mxu2 %vm254_vm0, %v1677_v29  ;;  %1476 = vmatmul.msk.f32.gmra.mxu3 %vm254_vm0, %v1677_v29 }
 0x143   : > { %v569_v59 = vpop.f32.mrf.mxu0  ;;  %v634_v60 = vpop.f32.mrf.mxu1 }
 0x144   : > { %1097 = vst [vmem:[%s1808_s20 + $0x140] sm:$0xff] %v569_v59 }
 0x145   : > { %1098 = vst [vmem:[%s1808_s20 + $0x148] sm:$0xff] %v634_v60  ;;  %v696_v61 = vpop.f32.mrf.mxu2  ;;  %v761_v62 = vpop.f32.mrf.mxu3 }
 0x146   : > { %1429 = vmatmul.msk.f32.gmra.mxu0 %vm254_vm0, %v1688_v30  ;;  %1445 = vmatmul.msk.f32.gmra.mxu1 %vm254_vm0, %v1688_v30  ;;  %1091 = vst [vmem:[%s1808_s20 + $0x110] sm:$0xff] %v696_v61 }
 0x147   : > { %1092 = vst [vmem:[%s1808_s20 + $0x118] sm:$0xff] %v761_v62 }
 0x14a   : > { %1461 = vmatmul.msk.f32.gmra.mxu2 %vm254_vm0, %v1688_v30  ;;  %1477 = vmatmul.msk.f32.gmra.mxu3 %vm254_vm0, %v1688_v30 }
 0x14b   : > { %v572_v63 = vpop.f32.mrf.mxu0  ;;  %v637_v0 = vpop.f32.mrf.mxu1 }
 0x14c   : > { %1105 = vst [vmem:[%s1808_s20 + $0x180] sm:$0xff] %v572_v63 }
 0x14d   : > { %1106 = vst [vmem:[%s1808_s20 + $0x188] sm:$0xff] %v637_v0  ;;  %v699_v1 = vpop.f32.mrf.mxu2  ;;  %v764_v2 = vpop.f32.mrf.mxu3 }
 0x14e   : > { %1430 = vmatmul.msk.f32.gmra.mxu0 %vm254_vm0, %v1699_v31  ;;  %1446 = vmatmul.msk.f32.gmra.mxu1 %vm254_vm0, %v1699_v31  ;;  %1099 = vst [vmem:[%s1808_s20 + $0x150] sm:$0xff] %v699_v1 }
 0x14f   : > { %1100 = vst [vmem:[%s1808_s20 + $0x158] sm:$0xff] %v764_v2 }
 0x152   : > { %1462 = vmatmul.msk.f32.gmra.mxu2 %vm254_vm0, %v1699_v31  ;;  %1478 = vmatmul.msk.f32.gmra.mxu3 %vm254_vm0, %v1699_v31 }
 0x153   : > { %v575_v3 = vpop.f32.mrf.mxu0  ;;  %v640_v4 = vpop.f32.mrf.mxu1 }
 0x154   : > { %1113 = vst [vmem:[%s1808_s20 + $0x1c0] sm:$0xff] %v575_v3 }
 0x155   : > { %1114 = vst [vmem:[%s1808_s20 + $0x1c8] sm:$0xff] %v640_v4  ;;  %v702_v5 = vpop.f32.mrf.mxu2  ;;  %v767_v6 = vpop.f32.mrf.mxu3 }
 0x156   : > { %1431 = vmatmul.msk.f32.gmra.mxu0 %vm254_vm0, %v1710_v32  ;;  %1447 = vmatmul.msk.f32.gmra.mxu1 %vm254_vm0, %v1710_v32  ;;  %1107 = vst [vmem:[%s1808_s20 + $0x190] sm:$0xff] %v702_v5 }
 0x157   : > { %1108 = vst [vmem:[%s1808_s20 + $0x198] sm:$0xff] %v767_v6 }
 0x15a   : > { %1463 = vmatmul.msk.f32.gmra.mxu2 %vm254_vm0, %v1710_v32  ;;  %1479 = vmatmul.msk.f32.gmra.mxu3 %vm254_vm0, %v1710_v32 }
 0x15b   : > { %v578_v7 = vpop.f32.mrf.mxu0  ;;  %v643_v8 = vpop.f32.mrf.mxu1 }
 0x15c   : > { %1121 = vst [vmem:[%s1808_s20 + $0x200] sm:$0xff] %v578_v7 }
 0x15d   : > { %1122 = vst [vmem:[%s1808_s20 + $0x208] sm:$0xff] %v643_v8  ;;  %v705_v9 = vpop.f32.mrf.mxu2  ;;  %v770_v10 = vpop.f32.mrf.mxu3 }
 0x15e   : > { %1432 = vmatmul.msk.f32.gmra.mxu0 %vm254_vm0, %v1721_v33  ;;  %1448 = vmatmul.msk.f32.gmra.mxu1 %vm254_vm0, %v1721_v33  ;;  %1115 = vst [vmem:[%s1808_s20 + $0x1d0] sm:$0xff] %v705_v9 }
 0x15f   : > { %1116 = vst [vmem:[%s1808_s20 + $0x1d8] sm:$0xff] %v770_v10 }
 0x162   : > { %1464 = vmatmul.msk.f32.gmra.mxu2 %vm254_vm0, %v1721_v33  ;;  %1480 = vmatmul.msk.f32.gmra.mxu3 %vm254_vm0, %v1721_v33 }
 0x163   : > { %v581_v11 = vpop.f32.mrf.mxu0  ;;  %v646_v12 = vpop.f32.mrf.mxu1 }
 0x164   : > { %1129 = vst [vmem:[%s1808_s20 + $0x240] sm:$0xff] %v581_v11 }
 0x165   : > { %1130 = vst [vmem:[%s1808_s20 + $0x248] sm:$0xff] %v646_v12  ;;  %v708_v13 = vpop.f32.mrf.mxu2  ;;  %v773_v14 = vpop.f32.mrf.mxu3 }
 0x166   : > { %1433 = vmatmul.msk.f32.gmra.mxu0 %vm254_vm0, %v1732_v34  ;;  %1449 = vmatmul.msk.f32.gmra.mxu1 %vm254_vm0, %v1732_v34  ;;  %1123 = vst [vmem:[%s1808_s20 + $0x210] sm:$0xff] %v708_v13 }
 0x167   : > { %1124 = vst [vmem:[%s1808_s20 + $0x218] sm:$0xff] %v773_v14 }
 0x16a   : > { %1465 = vmatmul.msk.f32.gmra.mxu2 %vm254_vm0, %v1732_v34  ;;  %1481 = vmatmul.msk.f32.gmra.mxu3 %vm254_vm0, %v1732_v34 }
 0x16b   : > { %v584_v15 = vpop.f32.mrf.mxu0  ;;  %v649_v16 = vpop.f32.mrf.mxu1 }
 0x16c   : > { %1137 = vst [vmem:[%s1808_s20 + $0x280] sm:$0xff] %v584_v15 }
 0x16d   : > { %1138 = vst [vmem:[%s1808_s20 + $0x288] sm:$0xff] %v649_v16  ;;  %v711_v17 = vpop.f32.mrf.mxu2  ;;  %v776_v18 = vpop.f32.mrf.mxu3 }
 0x16e   : > { %1434 = vmatmul.msk.f32.gmra.mxu0 %vm254_vm0, %v1743_v35  ;;  %1450 = vmatmul.msk.f32.gmra.mxu1 %vm254_vm0, %v1743_v35  ;;  %1131 = vst [vmem:[%s1808_s20 + $0x250] sm:$0xff] %v711_v17 }
 0x16f   : > { %1132 = vst [vmem:[%s1808_s20 + $0x258] sm:$0xff] %v776_v18 }
 0x172   : > { %1466 = vmatmul.msk.f32.gmra.mxu2 %vm254_vm0, %v1743_v35  ;;  %1482 = vmatmul.msk.f32.gmra.mxu3 %vm254_vm0, %v1743_v35 }
 0x173   : > { %v587_v19 = vpop.f32.mrf.mxu0  ;;  %v652_v20 = vpop.f32.mrf.mxu1 }
 0x174   : > { %1145 = vst [vmem:[%s1808_s20 + $0x2c0] sm:$0xff] %v587_v19 }
 0x175   : > { %1146 = vst [vmem:[%s1808_s20 + $0x2c8] sm:$0xff] %v652_v20  ;;  %v714_v21 = vpop.f32.mrf.mxu2  ;;  %v779_v22 = vpop.f32.mrf.mxu3 }
 0x176   : > { %1435 = vmatmul.msk.f32.gmra.mxu0 %vm254_vm0, %v1754_v36  ;;  %1451 = vmatmul.msk.f32.gmra.mxu1 %vm254_vm0, %v1754_v36  ;;  %1139 = vst [vmem:[%s1808_s20 + $0x290] sm:$0xff] %v714_v21 }
 0x177   : > { %1140 = vst [vmem:[%s1808_s20 + $0x298] sm:$0xff] %v779_v22 }
 0x17a   : > { %1467 = vmatmul.msk.f32.gmra.mxu2 %vm254_vm0, %v1754_v36  ;;  %1483 = vmatmul.msk.f32.gmra.mxu3 %vm254_vm0, %v1754_v36 }
 0x17b   : > { %v590_v23 = vpop.f32.mrf.mxu0  ;;  %v655_v24 = vpop.f32.mrf.mxu1 }
 0x17c   : > { %1153 = vst [vmem:[%s1808_s20 + $0x300] sm:$0xff] %v590_v23 }
 0x17d   : > { %1154 = vst [vmem:[%s1808_s20 + $0x308] sm:$0xff] %v655_v24  ;;  %v717_v25 = vpop.f32.mrf.mxu2  ;;  %v782_v26 = vpop.f32.mrf.mxu3 }
 0x17e   : > { %1436 = vmatmul.msk.f32.gmra.mxu0 %vm254_vm0, %v1765_v37  ;;  %1452 = vmatmul.msk.f32.gmra.mxu1 %vm254_vm0, %v1765_v37  ;;  %1147 = vst [vmem:[%s1808_s20 + $0x2d0] sm:$0xff] %v717_v25 }
 0x17f   : > { %1148 = vst [vmem:[%s1808_s20 + $0x2d8] sm:$0xff] %v782_v26 }
 0x182   : > { %1468 = vmatmul.msk.f32.gmra.mxu2 %vm254_vm0, %v1765_v37  ;;  %1484 = vmatmul.msk.f32.gmra.mxu3 %vm254_vm0, %v1765_v37 }
 0x183   : > { %v593_v27 = vpop.f32.mrf.mxu0  ;;  %v658_v28 = vpop.f32.mrf.mxu1 }
 0x184   : > { %1161 = vst [vmem:[%s1808_s20 + $0x340] sm:$0xff] %v593_v27 }
 0x185   : > { %1162 = vst [vmem:[%s1808_s20 + $0x348] sm:$0xff] %v658_v28  ;;  %v720_v29 = vpop.f32.mrf.mxu2  ;;  %v785_v30 = vpop.f32.mrf.mxu3 }
 0x186   : > { %1437 = vmatmul.msk.f32.gmra.mxu0 %vm254_vm0, %v1776_v38  ;;  %1453 = vmatmul.msk.f32.gmra.mxu1 %vm254_vm0, %v1776_v38  ;;  %1155 = vst [vmem:[%s1808_s20 + $0x310] sm:$0xff] %v720_v29 }
 0x187   : > { %1156 = vst [vmem:[%s1808_s20 + $0x318] sm:$0xff] %v785_v30 }
 0x18a   : > { %1469 = vmatmul.msk.f32.gmra.mxu2 %vm254_vm0, %v1776_v38  ;;  %1485 = vmatmul.msk.f32.gmra.mxu3 %vm254_vm0, %v1776_v38 }
 0x18b   : > { %v596_v31 = vpop.f32.mrf.mxu0  ;;  %v661_v32 = vpop.f32.mrf.mxu1 }
 0x18c   : > { %1169 = vst [vmem:[%s1808_s20 + $0x380] sm:$0xff] %v596_v31 }
 0x18d   : > { %1170 = vst [vmem:[%s1808_s20 + $0x388] sm:$0xff] %v661_v32  ;;  %v723_v33 = vpop.f32.mrf.mxu2  ;;  %v788_v34 = vpop.f32.mrf.mxu3 }
 0x18e   : > { %1438 = vmatmul.msk.f32.gmra.mxu0 %vm254_vm0, %v1787_v39  ;;  %1454 = vmatmul.msk.f32.gmra.mxu1 %vm254_vm0, %v1787_v39  ;;  %1163 = vst [vmem:[%s1808_s20 + $0x350] sm:$0xff] %v723_v33 }
 0x18f   : > { %1164 = vst [vmem:[%s1808_s20 + $0x358] sm:$0xff] %v788_v34 }
 0x192   : > { %1470 = vmatmul.msk.f32.gmra.mxu2 %vm254_vm0, %v1787_v39  ;;  %1486 = vmatmul.msk.f32.gmra.mxu3 %vm254_vm0, %v1787_v39 }
 0x193   : > { %v599_v35 = vpop.f32.mrf.mxu0  ;;  %v664_v36 = vpop.f32.mrf.mxu1 }
 0x194   : > { %1177 = vst [vmem:[%s1808_s20 + $0x3c0] sm:$0xff] %v599_v35 }
 0x195   : > { %1178 = vst [vmem:[%s1808_s20 + $0x3c8] sm:$0xff] %v664_v36  ;;  %v726_v37 = vpop.f32.mrf.mxu2  ;;  %v791_v38 = vpop.f32.mrf.mxu3 }
 0x196   : > { %1439 = vmatmul.msk.f32.gmra.mxu0 %vm254_vm0, %v1798_v40  ;;  %1455 = vmatmul.msk.f32.gmra.mxu1 %vm254_vm0, %v1798_v40  ;;  %1171 = vst [vmem:[%s1808_s20 + $0x390] sm:$0xff] %v726_v37 }
 0x197   : > { %1172 = vst [vmem:[%s1808_s20 + $0x398] sm:$0xff] %v791_v38 }
 0x19a   : > { %1471 = vmatmul.msk.f32.gmra.mxu2 %vm254_vm0, %v1798_v40  ;;  %1487 = vmatmul.msk.f32.gmra.mxu3 %vm254_vm0, %v1798_v40 }
 0x19b   : > { %v814_v41 = vpop.f32.mrf.mxu0  ;;  %v879_v42 = vpop.f32.mrf.mxu1 }
 0x19c   : > { %1061 = vst [vmem:[%s1808_s20 + $0x20] sm:$0xff] %v814_v41 }
 0x19d   : > { %1062 = vst [vmem:[%s1808_s20 + $0x28] sm:$0xff] %v879_v42  ;;  %v729_v39 = vpop.f32.mrf.mxu2  ;;  %v794_v43 = vpop.f32.mrf.mxu3 }
 0x19e   : > { %1179 = vst [vmem:[%s1808_s20 + $0x3d0] sm:$0xff] %v729_v39 }
 0x19f   : > { %1180 = vst [vmem:[%s1808_s20 + $0x3d8] sm:$0xff] %v794_v43 }
 0x1a3   : > { %v817_v44 = vpop.f32.mrf.mxu0  ;;  %v882_v45 = vpop.f32.mrf.mxu1 }
 0x1a4   : > { %1069 = vst [vmem:[%s1808_s20 + $0x60] sm:$0xff] %v817_v44 }
 0x1a5   : > { %1070 = vst [vmem:[%s1808_s20 + $0x68] sm:$0xff] %v882_v45  ;;  %v944_v46 = vpop.f32.mrf.mxu2  ;;  %v1009_v47 = vpop.f32.mrf.mxu3 }
 0x1a6   : > { %1063 = vst [vmem:[%s1808_s20 + $0x30] sm:$0xff] %v944_v46 }
 0x1a7   : > { %1064 = vst [vmem:[%s1808_s20 + $0x38] sm:$0xff] %v1009_v47 }
 0x1ab   : > { %v820_v40 = vpop.f32.mrf.mxu0  ;;  %v885_v48 = vpop.f32.mrf.mxu1 }
 0x1ac   : > { %1077 = vst [vmem:[%s1808_s20 + $0xa0] sm:$0xff] %v820_v40 }
 0x1ad   : > { %1078 = vst [vmem:[%s1808_s20 + $0xa8] sm:$0xff] %v885_v48  ;;  %v947_v49 = vpop.f32.mrf.mxu2  ;;  %v1012_v50 = vpop.f32.mrf.mxu3 }
 0x1ae   : > { %1071 = vst [vmem:[%s1808_s20 + $0x70] sm:$0xff] %v947_v49 }
 0x1af   : > { %1072 = vst [vmem:[%s1808_s20 + $0x78] sm:$0xff] %v1012_v50 }
 0x1b3   : > { %v823_v51 = vpop.f32.mrf.mxu0  ;;  %v888_v52 = vpop.f32.mrf.mxu1 }
 0x1b4   : > { %1085 = vst [vmem:[%s1808_s20 + $0xe0] sm:$0xff] %v823_v51 }
 0x1b5   : > { %1086 = vst [vmem:[%s1808_s20 + $0xe8] sm:$0xff] %v888_v52  ;;  %v950_v53 = vpop.f32.mrf.mxu2  ;;  %v1015_v54 = vpop.f32.mrf.mxu3 }
 0x1b6   : > { %1079 = vst [vmem:[%s1808_s20 + $0xb0] sm:$0xff] %v950_v53 }
 0x1b7   : > { %1080 = vst [vmem:[%s1808_s20 + $0xb8] sm:$0xff] %v1015_v54 }
 0x1bb   : > { %v826_v55 = vpop.f32.mrf.mxu0  ;;  %v891_v56 = vpop.f32.mrf.mxu1 }
 0x1bc   : > { %1093 = vst [vmem:[%s1808_s20 + $0x120] sm:$0xff] %v826_v55 }
 0x1bd   : > { %1094 = vst [vmem:[%s1808_s20 + $0x128] sm:$0xff] %v891_v56  ;;  %v953_v57 = vpop.f32.mrf.mxu2  ;;  %v1018_v58 = vpop.f32.mrf.mxu3 }
 0x1be   : > { %1087 = vst [vmem:[%s1808_s20 + $0xf0] sm:$0xff] %v953_v57 }
 0x1bf   : > { %1088 = vst [vmem:[%s1808_s20 + $0xf8] sm:$0xff] %v1018_v58 }
 0x1c3   : > { %v829_v59 = vpop.f32.mrf.mxu0  ;;  %v894_v60 = vpop.f32.mrf.mxu1 }
 0x1c4   : > { %1101 = vst [vmem:[%s1808_s20 + $0x160] sm:$0xff] %v829_v59 }
 0x1c5   : > { %1102 = vst [vmem:[%s1808_s20 + $0x168] sm:$0xff] %v894_v60  ;;  %v956_v61 = vpop.f32.mrf.mxu2  ;;  %v1021_v62 = vpop.f32.mrf.mxu3 }
 0x1c6   : > { %1095 = vst [vmem:[%s1808_s20 + $0x130] sm:$0xff] %v956_v61 }
 0x1c7   : > { %1096 = vst [vmem:[%s1808_s20 + $0x138] sm:$0xff] %v1021_v62 }
 0x1cb   : > { %v832_v63 = vpop.f32.mrf.mxu0  ;;  %v897_v0 = vpop.f32.mrf.mxu1 }
 0x1cc   : > { %1109 = vst [vmem:[%s1808_s20 + $0x1a0] sm:$0xff] %v832_v63 }
 0x1cd   : > { %1110 = vst [vmem:[%s1808_s20 + $0x1a8] sm:$0xff] %v897_v0  ;;  %v959_v1 = vpop.f32.mrf.mxu2  ;;  %v1024_v2 = vpop.f32.mrf.mxu3 }
 0x1ce   : > { %1103 = vst [vmem:[%s1808_s20 + $0x170] sm:$0xff] %v959_v1 }
 0x1cf   : > { %1104 = vst [vmem:[%s1808_s20 + $0x178] sm:$0xff] %v1024_v2 }
 0x1d3   : > { %v835_v3 = vpop.f32.mrf.mxu0  ;;  %v900_v4 = vpop.f32.mrf.mxu1 }
 0x1d4   : > { %1117 = vst [vmem:[%s1808_s20 + $0x1e0] sm:$0xff] %v835_v3 }
 0x1d5   : > { %1118 = vst [vmem:[%s1808_s20 + $0x1e8] sm:$0xff] %v900_v4  ;;  %v962_v5 = vpop.f32.mrf.mxu2  ;;  %v1027_v6 = vpop.f32.mrf.mxu3 }
 0x1d6   : > { %1111 = vst [vmem:[%s1808_s20 + $0x1b0] sm:$0xff] %v962_v5 }
 0x1d7   : > { %1112 = vst [vmem:[%s1808_s20 + $0x1b8] sm:$0xff] %v1027_v6 }
 0x1db   : > { %v838_v7 = vpop.f32.mrf.mxu0  ;;  %v903_v8 = vpop.f32.mrf.mxu1 }
 0x1dc   : > { %1125 = vst [vmem:[%s1808_s20 + $0x220] sm:$0xff] %v838_v7 }
 0x1dd   : > { %1126 = vst [vmem:[%s1808_s20 + $0x228] sm:$0xff] %v903_v8  ;;  %v965_v9 = vpop.f32.mrf.mxu2  ;;  %v1030_v10 = vpop.f32.mrf.mxu3 }
 0x1de   : > { %1119 = vst [vmem:[%s1808_s20 + $0x1f0] sm:$0xff] %v965_v9 }
 0x1df   : > { %1120 = vst [vmem:[%s1808_s20 + $0x1f8] sm:$0xff] %v1030_v10 }
 0x1e3   : > { %v841_v11 = vpop.f32.mrf.mxu0  ;;  %v906_v12 = vpop.f32.mrf.mxu1 }
 0x1e4   : > { %1133 = vst [vmem:[%s1808_s20 + $0x260] sm:$0xff] %v841_v11 }
 0x1e5   : > { %1134 = vst [vmem:[%s1808_s20 + $0x268] sm:$0xff] %v906_v12  ;;  %v968_v13 = vpop.f32.mrf.mxu2  ;;  %v1033_v14 = vpop.f32.mrf.mxu3 }
 0x1e6   : > { %1127 = vst [vmem:[%s1808_s20 + $0x230] sm:$0xff] %v968_v13 }
 0x1e7   : > { %1128 = vst [vmem:[%s1808_s20 + $0x238] sm:$0xff] %v1033_v14 }
 0x1eb   : > { %v844_v15 = vpop.f32.mrf.mxu0  ;;  %v909_v16 = vpop.f32.mrf.mxu1 }
 0x1ec   : > { %1141 = vst [vmem:[%s1808_s20 + $0x2a0] sm:$0xff] %v844_v15 }
 0x1ed   : > { %1142 = vst [vmem:[%s1808_s20 + $0x2a8] sm:$0xff] %v909_v16  ;;  %v971_v17 = vpop.f32.mrf.mxu2  ;;  %v1036_v18 = vpop.f32.mrf.mxu3 }
 0x1ee   : > { %1135 = vst [vmem:[%s1808_s20 + $0x270] sm:$0xff] %v971_v17 }
 0x1ef   : > { %1136 = vst [vmem:[%s1808_s20 + $0x278] sm:$0xff] %v1036_v18 }
 0x1f3   : > { %v847_v19 = vpop.f32.mrf.mxu0  ;;  %v912_v20 = vpop.f32.mrf.mxu1 }
 0x1f4   : > { %1149 = vst [vmem:[%s1808_s20 + $0x2e0] sm:$0xff] %v847_v19 }
 0x1f5   : > { %1150 = vst [vmem:[%s1808_s20 + $0x2e8] sm:$0xff] %v912_v20  ;;  %v974_v21 = vpop.f32.mrf.mxu2  ;;  %v1039_v22 = vpop.f32.mrf.mxu3 }
 0x1f6   : > { %1143 = vst [vmem:[%s1808_s20 + $0x2b0] sm:$0xff] %v974_v21 }
 0x1f7   : > { %1144 = vst [vmem:[%s1808_s20 + $0x2b8] sm:$0xff] %v1039_v22 }
 0x1fb   : > { %v850_v23 = vpop.f32.mrf.mxu0  ;;  %v915_v24 = vpop.f32.mrf.mxu1 }
 0x1fc   : > { %1157 = vst [vmem:[%s1808_s20 + $0x320] sm:$0xff] %v850_v23 }
 0x1fd   : > { %1158 = vst [vmem:[%s1808_s20 + $0x328] sm:$0xff] %v915_v24  ;;  %v977_v25 = vpop.f32.mrf.mxu2  ;;  %v1042_v26 = vpop.f32.mrf.mxu3 }
 0x1fe   : > { %1151 = vst [vmem:[%s1808_s20 + $0x2f0] sm:$0xff] %v977_v25 }
 0x1ff   : > { %1152 = vst [vmem:[%s1808_s20 + $0x2f8] sm:$0xff] %v1042_v26 }
 0x203   : > { %v853_v27 = vpop.f32.mrf.mxu0  ;;  %v918_v28 = vpop.f32.mrf.mxu1 }
 0x204   : > { %1165 = vst [vmem:[%s1808_s20 + $0x360] sm:$0xff] %v853_v27 }
 0x205   : > { %1166 = vst [vmem:[%s1808_s20 + $0x368] sm:$0xff] %v918_v28  ;;  %v980_v29 = vpop.f32.mrf.mxu2  ;;  %v1045_v30 = vpop.f32.mrf.mxu3 }
 0x206   : > { %1159 = vst [vmem:[%s1808_s20 + $0x330] sm:$0xff] %v980_v29 }
 0x207   : > { %1160 = vst [vmem:[%s1808_s20 + $0x338] sm:$0xff] %v1045_v30 }
 0x20b   : > { %v856_v31 = vpop.f32.mrf.mxu0  ;;  %v921_v32 = vpop.f32.mrf.mxu1 }
 0x20c   : > { %1173 = vst [vmem:[%s1808_s20 + $0x3a0] sm:$0xff] %v856_v31 }
 0x20d   : > { %1174 = vst [vmem:[%s1808_s20 + $0x3a8] sm:$0xff] %v921_v32  ;;  %v983_v33 = vpop.f32.mrf.mxu2  ;;  %v1048_v34 = vpop.f32.mrf.mxu3 }
 0x20e   : > { %1167 = vst [vmem:[%s1808_s20 + $0x370] sm:$0xff] %v983_v33 }
 0x20f   : > { %1168 = vst [vmem:[%s1808_s20 + $0x378] sm:$0xff] %v1048_v34 }
 0x213   : > { %v859_v35 = vpop.f32.mrf.mxu0  ;;  %v924_v36 = vpop.f32.mrf.mxu1 }
 0x214   : > { %1181 = vst [vmem:[%s1808_s20 + $0x3e0] sm:$0xff] %v859_v35 }
 0x215   : > { %1182 = vst [vmem:[%s1808_s20 + $0x3e8] sm:$0xff] %v924_v36  ;;  %v986_v37 = vpop.f32.mrf.mxu2  ;;  %v1051_v38 = vpop.f32.mrf.mxu3 }
 0x216   : > { %1175 = vst [vmem:[%s1808_s20 + $0x3b0] sm:$0xff] %v986_v37 }
 0x217   : > { %1176 = vst [vmem:[%s1808_s20 + $0x3b8] sm:$0xff] %v1051_v38 }
 0x21d   : > { %v989_v41 = vpop.f32.mrf.mxu2  ;;  %v1054_v42 = vpop.f32.mrf.mxu3 }
 0x21e   : > { %1183 = vst [vmem:[%s1808_s20 + $0x3f0] sm:$0xff] %v989_v41 }
 0x21f   : > { %1184 = vst [vmem:[%s1808_s20 + $0x3f8] sm:$0xff] %v1054_v42 }
 0x220 PF: > { %s13_s14 = sadd.s32 1, %s1548_s14   ;;  %s2083_s12 = smov %s1544_s13 }
 0x221   : > { %p10_p5 = scmp.ge.s32.totalorder %s13_s14, 6   ;;  %s2084_s13 = smov %s2086_s15 }
 0x223   :  { %12 = sbr.rel (!%p10_p5) target bundleno = 2 (0x2), region = 69 }

</bundles_post_ra>
